<compile_context>
chip_gen: v7x
topology: tpu7x:2x2x1
jax: 0.10.0
libtpu: 0.0.40
codegen_flags: <defaults>
</compile_context>

<pallas_src>
import jax
import jax.numpy as jnp
import numpy as np
from jax import lax
from jax.experimental import pallas as pl
from jax.experimental.pallas import tpu as pltpu

_LANE = 128


# ----------------------------------------------------------------------------
# Kernels
# ----------------------------------------------------------------------------
def _mix_image_kernel(perm_ref, lam_ref, x_ref, xs_ref, o_ref):
    """o = lam * x + (1 - lam) * x[perm] on a lane-dense (1, rows_blk, 128) tile.

    xs_ref is the same HBM array as x, block-indexed through the prefetched
    permutation (see index_map), so the gather never touches the host.
    """
    del perm_ref  # consumed only by the index_maps
    lam = lam_ref[0]
    a = x_ref[...].astype(jnp.float32)
    b = xs_ref[...].astype(jnp.float32)
    o_ref[...] = (lam * a + (1.0 - lam) * b).astype(o_ref.dtype)


def _mix_label_kernel(lam_ref, y_ref, ys_ref, o_ref):
    """o = lam * y + (1 - lam) * y[perm] for the whole (bs, k) label block."""
    lam = lam_ref[0]
    a = y_ref[...].astype(jnp.float32)
    b = ys_ref[...].astype(jnp.float32)
    o_ref[...] = (lam * a + (1.0 - lam) * b).astype(o_ref.dtype)


# ----------------------------------------------------------------------------
# pallas_call wrappers
# ----------------------------------------------------------------------------
def _blend_images(x, perm, lam_arr):
    """lam * x + (1 - lam) * x[perm]  for x of shape [bs, ch, h, w]."""
    bs = x.shape[0]
    n = int(np.prod(x.shape[1:]))
    dtype = x.dtype

    # Lane-dense layout: fold ch*h*w, pad to a multiple of 128 lanes.
    xf = x.reshape(bs, n)
    n_pad = -(-n // _LANE) * _LANE
    if n_pad != n:
        xf = jnp.pad(xf, ((0, 0), (0, n_pad - n)))
    rows = n_pad // _LANE
    x3 = xf.reshape(bs, rows, _LANE)

    # Block = one batch row's (possibly chunked) payload.  Chunk so that
    # 3 arrays x 2 pipeline buffers x block bytes stays well inside the scoped
    # VMEM budget on every TPU generation (~2 MiB blocks -> ~12 MiB total).
    itemsize = np.dtype(dtype).itemsize
    max_rows = max(8, (2 * 1024 * 1024) // (_LANE * itemsize))
    if rows <= max_rows:
        rows_blk = rows
    else:
        rows_blk = (max_rows // 8) * 8
    n_chunks = -(-rows // rows_blk)

    out = pl.pallas_call(
        _mix_image_kernel,
        out_shape=jax.ShapeDtypeStruct(x3.shape, dtype),
        grid_spec=pltpu.PrefetchScalarGridSpec(
            num_scalar_prefetch=1,            # perm -> SMEM, fed to index_maps
            grid=(bs, n_chunks),
            in_specs=[
                pl.BlockSpec(memory_space=pltpu.MemorySpace.SMEM),       # lam
                pl.BlockSpec((1, rows_blk, _LANE),
                             lambda b, c, perm: (b, c, 0)),              # x[b]
                pl.BlockSpec((1, rows_blk, _LANE),
                             lambda b, c, perm: (perm[b], c, 0)),        # x[perm[b]]
            ],
            out_specs=pl.BlockSpec((1, rows_blk, _LANE),
                                   lambda b, c, perm: (b, c, 0)),
        ),
        compiler_params=pltpu.CompilerParams(
            dimension_semantics=("parallel", "parallel")),
    )(perm, lam_arr, x3, x3)

    out = out.reshape(bs, n_pad)
    if n_pad != n:
        out = out[:, :n]
    return out.reshape(x.shape)


def _blend_labels(y, perm, lam_arr):
    """lam * y + (1 - lam) * y[perm]  for y of shape [bs, k] (single block)."""
    bs, k = y.shape
    ys = jnp.take(y, perm, axis=0)   # tiny (bs, k) gather, left to XLA
    return pl.pallas_call(
        _mix_label_kernel,
        out_shape=jax.ShapeDtypeStruct(y.shape, y.dtype),
        grid_spec=pltpu.PrefetchScalarGridSpec(
            num_scalar_prefetch=0,
            grid=(1,),
            in_specs=[
                pl.BlockSpec(memory_space=pltpu.MemorySpace.SMEM),   # lam
                pl.BlockSpec((bs, k), lambda i: (0, 0)),             # y
                pl.BlockSpec((bs, k), lambda i: (0, 0)),             # y[perm]
            ],
            out_specs=pl.BlockSpec((bs, k), lambda i: (0, 0)),
        ),
        compiler_params=pltpu.CompilerParams(
            dimension_semantics=("arbitrary",)),
    )(lam_arr, y, ys)


# ----------------------------------------------------------------------------
# Module equivalent (fully jittable, randomness stays on device)
# ----------------------------------------------------------------------------
def mixup(x, y=None, *, p=0.5, key=None):
    """Functional equivalent of MixUp.forward (returns new arrays)."""
    bs = x.shape[0]
    k_apply, k_perm, k_lam = jax.random.split(key, 3)
    apply = jax.random.uniform(k_apply) < p
    perm = jax.random.permutation(k_perm, bs).astype(jnp.int32)
    lmda = jnp.sqrt(jax.random.uniform(k_lam)).astype(jnp.float32)
    lam_arr = lmda.reshape(1)

    if y is None:
        return lax.cond(apply,
                        lambda xi: _blend_images(xi, perm, lam_arr),
                        lambda xi: xi,
                        x)
    return lax.cond(apply,
                    lambda ops: (_blend_images(ops[0], perm, lam_arr),
                                 _blend_labels(ops[1], perm, lam_arr)),
                    lambda ops: ops,
                    (x, y))


# ----------------------------------------------------------------------------
# Demo / self-check
# ----------------------------------------------------------------------------
if __name__ == "__main__":
    key = jax.random.PRNGKey(0)
    kx, ky, kaug = jax.random.split(key, 3)

    bs, ch, h, w, k = 2, 4, 16, 16, 8
    x = jax.random.normal(kx, (bs, ch, h, w), dtype=jnp.float32)
    y = jax.nn.one_hot(jax.random.randint(ky, (bs,), 0, k), k, dtype=jnp.float32)

    p = 1.0  # force the mix path in this demo
    mix = jax.jit(lambda x, y, key: mixup(x, y, p=p, key=key))
    x_out, y_out = mix(x, y, kaug)
    jax.block_until_ready((x_out, y_out))

    # Pure numpy reference using the identical on-device random draws.
    k_apply, k_perm, k_lam = jax.random.split(kaug, 3)
    apply = bool(jax.random.uniform(k_apply) < p)
    perm = np.array(jax.random.permutation(k_perm, bs).astype(jnp.int32))
    lmda = np.float32(jnp.sqrt(jax.random.uniform(k_lam)))
    x_np, y_np = np.array(x), np.array(y)
    if apply:
        x_ref = lmda * x_np + (np.float32(1.0) - lmda) * x_np[perm]
        y_ref = lmda * y_np + (np.float32(1.0) - lmda) * y_np[perm]
    else:
        x_ref, y_ref = x_np, y_np

    assert np.allclose(np.array(x_out), x_ref, atol=1e-5)
    assert np.allclose(np.array(y_out), y_ref, atol=1e-5)
    print("KERNEL_OK")
</pallas_src>

<mosaic_0001>
module attributes {stable_mosaic.version = 11 : i64} {
  func.func @_mix_image_kernel(%arg0: i32, %arg1: i32, %arg2: memref<2xi32, #tpu.memory_space<smem>>, %arg3: memref<1xf32, #tpu.memory_space<smem>>, %arg4: memref<1x8x128xf32, #tpu.memory_space<vmem>>, %arg5: memref<1x8x128xf32, #tpu.memory_space<vmem>>, %arg6: memref<1x8x128xf32, #tpu.memory_space<vmem>>) attributes {dimension_semantics = [#tpu.dimension_semantics<parallel>, #tpu.dimension_semantics<parallel>], iteration_bounds = array<i64: 2, 1>, scalar_prefetch = 1 : i64, scratch_operands = 0 : i64, tpu.core_type = #tpu.core_type<tc>, window_params = [{transform_indices = @transform_0, window_bounds = array<i64: 1>}, {transform_indices = @transform_1, window_bounds = array<i64: 1, 8, 128>}, {transform_indices = @transform_2, window_bounds = array<i64: 1, 8, 128>}, {transform_indices = @transform_3, window_bounds = array<i64: 1, 8, 128>}]} {
    %c0 = arith.constant 0 : index
    %0 = memref.load %arg3[%c0] : memref<1xf32, #tpu.memory_space<smem>>
    %c0_0 = arith.constant 0 : index
    %c0_1 = arith.constant 0 : index
    %c0_2 = arith.constant 0 : index
    %1 = vector.load %arg4[%c0_0, %c0_1, %c0_2] : memref<1x8x128xf32, #tpu.memory_space<vmem>>, vector<1x8x128xf32>
    %c0_3 = arith.constant 0 : index
    %c0_4 = arith.constant 0 : index
    %c0_5 = arith.constant 0 : index
    %2 = vector.load %arg5[%c0_3, %c0_4, %c0_5] : memref<1x8x128xf32, #tpu.memory_space<vmem>>, vector<1x8x128xf32>
    %3 = vector.broadcast %0 : f32 to vector<1x8x128xf32>
    %4 = arith.mulf %3, %1 : vector<1x8x128xf32>
    %cst = arith.constant 1.000000e+00 : f32
    %5 = arith.subf %cst, %0 : f32
    %6 = vector.broadcast %5 : f32 to vector<1x8x128xf32>
    %7 = arith.mulf %6, %2 : vector<1x8x128xf32>
    %8 = arith.addf %4, %7 : vector<1x8x128xf32>
    %c0_6 = arith.constant 0 : index
    %c0_7 = arith.constant 0 : index
    %c0_8 = arith.constant 0 : index
    %9 = vector.load %arg6[%c0_6, %c0_7, %c0_8] : memref<1x8x128xf32, #tpu.memory_space<vmem>>, vector<1x8x128xf32>
    tpu.vector_store %arg6[%c0_6, %c0_7, %c0_8], %8 {strides = array<i32>} : memref<1x8x128xf32, #tpu.memory_space<vmem>>, vector<1x8x128xf32>,
    return
  }
  func.func @transform_0(%arg0: i32, %arg1: i32, %arg2: memref<2xi32, #tpu.memory_space<smem>>) -> i32 {
    %c0_i32 = arith.constant 0 : i32
    %c0_i32_0 = arith.constant 0 : i32
    return %c0_i32 : i32
  }
  func.func @transform_1(%arg0: i32, %arg1: i32, %arg2: memref<2xi32, #tpu.memory_space<smem>>) -> (i32, i32, i32) {
    %c0_i32 = arith.constant 0 : i32
    %c0_i32_0 = arith.constant 0 : i32
    return %arg0, %arg1, %c0_i32 : i32, i32, i32
  }
  func.func @transform_2(%arg0: i32, %arg1: i32, %arg2: memref<2xi32, #tpu.memory_space<smem>>) -> (i32, i32, i32) {
    %0 = arith.index_cast %arg0 : i32 to index
    %1 = memref.load %arg2[%0] : memref<2xi32, #tpu.memory_space<smem>>
    %c0_i32 = arith.constant 0 : i32
    %c0_i32_0 = arith.constant 0 : i32
    return %1, %arg1, %c0_i32 : i32, i32, i32
  }
  func.func @transform_3(%arg0: i32, %arg1: i32, %arg2: memref<2xi32, #tpu.memory_space<smem>>) -> (i32, i32, i32) {
    %c0_i32 = arith.constant 0 : i32
    %c0_i32_0 = arith.constant 0 : i32
    return %arg0, %arg1, %c0_i32 : i32, i32, i32
  }
}

module attributes {stable_mosaic.version = 11 : i64} {
  func.func @_mix_label_kernel(%arg0: i32, %arg1: memref<1xf32, #tpu.memory_space<smem>>, %arg2: memref<2x8xf32, #tpu.memory_space<vmem>>, %arg3: memref<2x8xf32, #tpu.memory_space<vmem>>, %arg4: memref<2x8xf32, #tpu.memory_space<vmem>>) attributes {dimension_semantics = [#tpu.dimension_semantics<arbitrary>], iteration_bounds = array<i64: 1>, scalar_prefetch = 0 : i64, scratch_operands = 0 : i64, tpu.core_type = #tpu.core_type<tc>, window_params = [{transform_indices = @transform_0, window_bounds = array<i64: 1>}, {pipeline_mode = #tpu.pipeline_mode<synchronous>, transform_indices = @transform_1, window_bounds = array<i64: 2, 8>}, {pipeline_mode = #tpu.pipeline_mode<synchronous>, transform_indices = @transform_2, window_bounds = array<i64: 2, 8>}, {pipeline_mode = #tpu.pipeline_mode<synchronous>, transform_indices = @transform_3, window_bounds = array<i64: 2, 8>}]} {
    %c0 = arith.constant 0 : index
    %0 = memref.load %arg1[%c0] : memref<1xf32, #tpu.memory_space<smem>>
    %c0_0 = arith.constant 0 : index
    %c0_1 = arith.constant 0 : index
    %1 = vector.load %arg2[%c0_0, %c0_1] : memref<2x8xf32, #tpu.memory_space<vmem>>, vector<2x8xf32>
    %c0_2 = arith.constant 0 : index
    %c0_3 = arith.constant 0 : index
    %2 = vector.load %arg3[%c0_2, %c0_3] : memref<2x8xf32, #tpu.memory_space<vmem>>, vector<2x8xf32>
    %3 = vector.broadcast %0 : f32 to vector<2x8xf32>
    %4 = arith.mulf %3, %1 : vector<2x8xf32>
    %cst = arith.constant 1.000000e+00 : f32
    %5 = arith.subf %cst, %0 : f32
    %6 = vector.broadcast %5 : f32 to vector<2x8xf32>
    %7 = arith.mulf %6, %2 : vector<2x8xf32>
    %8 = arith.addf %4, %7 : vector<2x8xf32>
    %c0_4 = arith.constant 0 : index
    %c0_5 = arith.constant 0 : index
    %9 = vector.load %arg4[%c0_4, %c0_5] : memref<2x8xf32, #tpu.memory_space<vmem>>, vector<2x8xf32>
    tpu.vector_store %arg4[%c0_4, %c0_5], %8 {strides = array<i32>} : memref<2x8xf32, #tpu.memory_space<vmem>>, vector<2x8xf32>,
    return
  }
  func.func @transform_0(%arg0: i32) -> i32 {
    %c0_i32 = arith.constant 0 : i32
    %c0_i32_0 = arith.constant 0 : i32
    return %c0_i32 : i32
  }
  func.func @transform_1(%arg0: i32) -> (i32, i32) {
    %c0_i32 = arith.constant 0 : i32
    %c0_i32_0 = arith.constant 0 : i32
    %c0_i32_1 = arith.constant 0 : i32
    return %c0_i32, %c0_i32_0 : i32, i32
  }
  func.func @transform_2(%arg0: i32) -> (i32, i32) {
    %c0_i32 = arith.constant 0 : i32
    %c0_i32_0 = arith.constant 0 : i32
    %c0_i32_1 = arith.constant 0 : i32
    return %c0_i32, %c0_i32_0 : i32, i32
  }
  func.func @transform_3(%arg0: i32) -> (i32, i32) {
    %c0_i32 = arith.constant 0 : i32
    %c0_i32_0 = arith.constant 0 : i32
    %c0_i32_1 = arith.constant 0 : i32
    return %c0_i32, %c0_i32_0 : i32, i32
  }
}

</mosaic_0001>

<bundles_post_ra>
// kernel: branch_1_fun.3
= control target key start
LH: loop header
LB: loop body
LE: loop exit
PB: predicated region body
PF: predicated region fallthrough
CT: control target
= control target key end

     0   :  { %s111_s0 = inlined_call_operand.<no memory space> [shape: f32[1], index: 0, kind: input, shape index: {}]   ;;  %s112_s1 = inlined_call_operand.vmem [shape: f32[2,8], index: 1, kind: input, shape index: {}]   ;;  %s113_s2 = inlined_call_operand.vmem [shape: f32[2,8], index: 2, kind: input, shape index: {}]   ;;  %s114_s3 = inlined_call_operand.hbm [shape: f32[2,8], index: 3, kind: output, shape index: {}]  }
   0x1   :  { %v17_v0 = vld [vmem:[%s112_s1] sm:$0x3]  ;;  %v19_v2 = vstv %s111_s0  ;;  %s21_s20 = ssub.f32 1.0, %s111_s0 }
   0x2   :  { %v18_v1 = vld [vmem:[%s113_s2] sm:$0x3]  ;;  %v20_v3 = vmul.f32 %v19_v2, %v17_v0 }
   0x3   :  { %9 = vsyncpa [#allocation4], 0  ;;  %v22_v4 = vstv %s21_s20  ;;  %s66_s21 = smov [#allocation3]   ;;  %vm25_vm0 = vcmask 58368  }
   0x4   :  { %s33_s22 = sshll.u32 %s66_s21, 4  ;;  %v23_v5 = vmul.f32 %v22_v4, %v18_v1  ;;  %s34_s22 = int_to_ptr.vmem [resolvable:$true] %s33_s22 }
   0x5   :  { %s42_s1 = scalar_lea.vmem %s34_s22, 32  ;;  %p47_p1 = scmp.lt.s32.totalorder %s34_s22, %s34_s22 }
   0x6   :  { %v24_v6 = vadd.f32 %v23_v5, %v20_v3  ;;  %p43_p0 = scmp.ne.s32.totalorder %s34_s22, %s42_s1  ;;  %p48_p2 = scmp.lt.s32.totalorder %s42_s1, %s42_s1 }
   0x8   :  { %26 = vst.msk [vmem:[#allocation3] sm:$0x3] %vm25_vm0, %v24_v6  ;;  %p49_p3 = por %p48_p2, %p47_p1 }
   0xa   :  { %p50_p4 = pnand %p49_p3, %p43_p0 }
   0xc   :  { %53 = shalt.err (!%p50_p4)
}
   0xd   :  { %s54_s0 = scalar_lea.hbm %s114_s3, 32 }
   0xe   :  { %p55_p5 = scmp.ne.s32.totalorder %s114_s3, %s54_s0  ;;  %p58_p6 = scmp.lt.u32.totalorder %s54_s0, %s114_s3 }
  0x10   :  { %p60_p7 = pnand %p58_p6, %p55_p5 }
  0x12   :  { %63 = shalt.err (!%p60_p7)
}
  0x13   :  { %36 = dma.vmem_to_hbm [thread:$0]  %s34_s22, 32, %s114_s3, [#allocation4]  }
  0x14   :  { %64 = dma.done.wait [#allocation4], 32  }
  0x15   :  { %65 = vsyncadd [#allocation4], 4294967264 }
  0x16   :  { %40 = vsyncpa [#allocation4], 1 }

// kernel: branch_1_fun.2
= control target key start
LH: loop header
LB: loop body
LE: loop exit
PB: predicated region body
PF: predicated region fallthrough
CT: control target
= control target key end

     0   :  { %s477_s0 = inlined_call_operand.vmem [shape: s32[2], index: 0, kind: input, shape index: {}]   ;;  %s478_s1 = inlined_call_operand.<no memory space> [shape: f32[1], index: 1, kind: input, shape index: {}]   ;;  %s479_s2 = inlined_call_operand.vmem [shape: f32[2,8,128], index: 2, kind: input, shape index: {}, may-alias: {2,3}]   ;;  %s480_s3 = inlined_call_operand.vmem [shape: f32[2,8,128], index: 3, kind: input, shape index: {}, may-alias: {2,3}]   ;;  %s481_s4 = inlined_call_operand.vmem [shape: f32[2,8,128], index: 4, kind: output, shape index: {}]  }
   0x1   :  { %s9_s17 = sshll.u32 %s477_s0, 4  ;;  %13 = sst [smem:[#allocation4]] %s478_s1  ;;  %s10_s17 = int_to_ptr.vmem [resolvable:$true] %s9_s17 }
   0x2   :  { %s374_s20 = scalar_lea.vmem %s10_s17, 16  ;;  %p379_p1 = scmp.lt.s32.totalorder %s10_s17, %s10_s17 }
   0x3   :  { %p375_p0 = scmp.ne.s32.totalorder %s10_s17, %s374_s20  ;;  %p380_p2 = scmp.lt.s32.totalorder %s374_s20, %s374_s20 }
   0x5   :  { %p381_p3 = por %p380_p2, %p379_p1 }
   0x7   :  { %p382_p4 = pnand %p381_p3, %p375_p0 }
   0x9   :  { %385 = shalt.err (!%p382_p4)  }
   0xa   :  { %s412_s21 = smov [#allocation3]  }
   0xb   :  { %12 = dma.vmem_to_smem %s10_s17, 16, %s412_s21, [#allocation2] }
   0xc   :  { %398 = dma.done.wait [#allocation2], 16 }
   0xd   :  { %399 = vsyncadd [#allocation2], 4294967280 }
   0xe   :  { %15 = sfence }
   0xf   :  { %s444_s22 = smov 0   ;;  %s446_s0 = smov 0  }
  0x10   :  { %s448_s23 = smov 0  }
  0x11 LB: > { %s33_s1 = sadd.s32 1, %s406_s0  ;;  %p343_p5 = scmp.ge.s32.totalorder %s410_s23, 1  ;;  %s410_s23 = sphi %s448_s23, %s21_s23   ;;  %s406_s0 = sphi %s446_s0, %s483_s0   ;;  %s402_s22 = sphi %s444_s22, %s482_s22  }
  0x12   : > { %p35_p6 = scmp.ge.s32.totalorder %s33_s1, 2  ;;  %p181_p7 = scmp.lt.s32.totalorder %s410_s23, 3 }
  0x14   : > { %s485_s1 = smov (%p35_p6, %s33_s1), 0  ;;  %p182_p8 = pnand %p343_p5, %p181_p7 }
  0x15   : > { %p217_p9 = scmp.lt.s32.totalorder (!%p182_p8), %s402_s22, 1  ;;  %s224_s24 = sld [smem:[#allocation3 + %s402_s22]] (!%p182_p8) }
  0x16   : > { %185 = sbr.rel (%p182_p8) target bundleno = 39 (0x27), region = 32  ;;  %s240_s25 = sld [smem:[#allocation4]] (!%p182_p8) }
  0x1b   : > { %p225_p10 = scmp.lt.s32.totalorder (!%p182_p8), %s224_s24, 1 }
  0x1c   : > { %s245_s30 = ssub.f32 (!%p182_p8), 1.0, %s240_s25  ;;  %v243_v1 = vstv (!%p182_p8), %s240_s25 }
  0x1d   : > { %s487_s22 = smov (!%p217_p9, %s402_s22), 1  ;;  %s489_s24 = smov (!%p225_p10, %s224_s24), 1 }
  0x1e   : > { %s344_s26 = sshll.u32 %s487_s22, 3  ;;  %s345_s5 = sshll.u32 %s489_s24, 3  ;;  %v246_v2 = vstv %s245_s30 }
  0x1f   : > { %s223_s29 = scalar_lea.vmem %s479_s2, %s344_s26  ;;  %s231_s8 = scalar_lea.vmem %s480_s3, %s345_s5 }
  0x20   : > { %v241_v0 = vld [vmem:[%s223_s29] sm:$0xff]  ;;  %s239_s11 = scalar_lea.vmem %s481_s4, %s344_s26 }
  0x21   : > { %v244_v3 = vmul.f32 %v243_v1, %v241_v0  ;;  %v242_v4 = vld [vmem:[%s231_s8] sm:$0xff] }
  0x22   : > { %v247_v5 = vmul.f32 %v246_v2, %v242_v4 }
  0x24   : > { %v248_v6 = vadd.f32 %v247_v5, %v244_v3 }
  0x26   : > { %249 = vst [vmem:[%s239_s11] sm:$0xff] %v248_v6 }
  0x27 PF: > { %s21_s23 = sadd.s32 1, %s410_s23   ;;  %s482_s22 = smov %s406_s0 }
  0x28   : > { %p18_p11 = scmp.ge.s32.totalorder %s21_s23, 4   ;;  %s483_s0 = smov %s485_s1 }
  0x2a   :  { %20 = sbr.rel (!%p18_p11) target bundleno = 17 (0x11), region = 65 }

</bundles_post_ra>
